<compile_context>
chip_gen: v7x
topology: tpu7x:2x2x1
jax: 0.10.0
libtpu: 0.0.40
codegen_flags: <defaults>
</compile_context>

<pallas_src>
import math

import jax
import jax.numpy as jnp
from jax.experimental import pallas as pl
from jax.experimental.pallas import tpu as pltpu


def _layer_scale_kernel(x_ref, g_ref, o_ref):
    # x_ref: (TR, Dp) tile of flattened tokens; g_ref: (1, Dp) gamma row.
    # Broadcast over rows is a plain VPU elementwise multiply.
    o_ref[...] = x_ref[...] * g_ref[...]


def _round_up(v, m):
    return ((v + m - 1) // m) * m


def layer_scale(x, gamma, *, target_tile_bytes=2 * 1024 * 1024, max_tile_rows=2048):
    """Computes x * gamma with gamma broadcast over the trailing feature axis.

    x: (..., D) float array, gamma: (D,) float array.
    """
    orig_shape = x.shape
    D = orig_shape[-1]
    assert gamma.shape == (D,), f"gamma shape {gamma.shape} != ({D},)"
    rows = math.prod(orig_shape[:-1]) if len(orig_shape) > 1 else 1

    itemsize = jnp.dtype(x.dtype).itemsize
    sublane = max(8, 32 // itemsize)       # 8 for f32, 16 for bf16, 32 for int8
    Dp = _round_up(D, 128)                 # lane-dense last dim

    # Biggest row tile (multiple of sublane packing) whose x-tile is roughly
    # target_tile_bytes, capped so 2 buffers x (in + out) always fits VMEM
    # (including v7x's 64 MiB) and so tiny inputs are not padded excessively.
    tile_rows = max(sublane,
                    (target_tile_bytes // max(Dp * itemsize, 1)) // sublane * sublane)
    tile_rows = min(tile_rows, max_tile_rows)
    tile_rows = min(tile_rows, _round_up(rows, sublane))

    rows_p = _round_up(rows, tile_rows)

    x2 = x.reshape(rows, D)
    needs_pad = (rows_p != rows) or (Dp != D)
    if needs_pad:
        x2 = jnp.pad(x2, ((0, rows_p - rows), (0, Dp - D)))

    g2 = gamma.astype(x.dtype).reshape(1, D)
    if Dp != D:
        g2 = jnp.pad(g2, ((0, 0), (0, Dp - D)))

    # VMEM budget: 2 pipeline buffers x (x tile + out tile) + gamma + headroom.
    tile_bytes = tile_rows * Dp * itemsize
    vmem_limit = int(min(4 * tile_bytes + 4 * Dp * itemsize + (8 << 20), 48 << 20))

    grid_steps = pl.cdiv(rows_p, tile_rows)
    out = pl.pallas_call(
        _layer_scale_kernel,
        out_shape=jax.ShapeDtypeStruct((rows_p, Dp), x.dtype),
        grid_spec=pltpu.PrefetchScalarGridSpec(
            num_scalar_prefetch=0,
            grid=(grid_steps,),
            in_specs=[
                pl.BlockSpec((tile_rows, Dp), lambda i: (i, 0)),
                # Constant index_map -> gamma stays resident across all steps.
                pl.BlockSpec((1, Dp), lambda i: (0, 0)),
            ],
            out_specs=pl.BlockSpec((tile_rows, Dp), lambda i: (i, 0)),
        ),
        compiler_params=pltpu.CompilerParams(
            dimension_semantics=("parallel",),
            vmem_limit_bytes=vmem_limit,
        ),
    )(x2, g2)

    if needs_pad:
        out = out[:rows, :D]
    return out.reshape(orig_shape)


if __name__ == "__main__":
    key = jax.random.PRNGKey(0)
    init_values = 1e-5

    # Case 1: aligned shapes (module-style batch of token sequences) —
    # exercises the zero-copy (no pad / no slice) fast path.
    B, N, D = 2, 8, 128
    k1, k2 = jax.random.split(key)
    x = jax.random.normal(k1, (B, N, D), dtype=jnp.float32)
    gamma = init_values * jnp.ones((D,), dtype=jnp.float32)
    y = layer_scale(x, gamma)
    jax.block_until_ready(y)
    assert y.shape == x.shape
    assert jnp.allclose(y, x * gamma, atol=1e-6, rtol=1e-6)

    # Case 2: ragged shapes (rows not a multiple of 8, D not a multiple of 128)
    # exercising the padding / tail-handling path.
    B2, N2, D2 = 2, 7, 100
    x2 = jax.random.normal(k2, (B2, N2, D2), dtype=jnp.float32)
    gamma2 = init_values * jnp.ones((D2,), dtype=jnp.float32)
    y2 = layer_scale(x2, gamma2)
    jax.block_until_ready(y2)
    assert y2.shape == x2.shape
    assert jnp.allclose(y2, x2 * gamma2, atol=1e-6, rtol=1e-6)

    print("KERNEL_OK")
</pallas_src>

<mosaic_0001>
module attributes {stable_mosaic.version = 11 : i64} {
  func.func @_layer_scale_kernel(%arg0: i32, %arg1: memref<16x128xf32, #tpu.memory_space<vmem>>, %arg2: memref<1x128xf32, #tpu.memory_space<vmem>>, %arg3: memref<16x128xf32, #tpu.memory_space<vmem>>) attributes {dimension_semantics = [#tpu.dimension_semantics<parallel>], iteration_bounds = array<i64: 1>, scalar_prefetch = 0 : i64, scratch_operands = 0 : i64, tpu.core_type = #tpu.core_type<tc>, window_params = [{transform_indices = @transform_0, window_bounds = array<i64: 16, 128>}, {pipeline_mode = #tpu.pipeline_mode<synchronous>, transform_indices = @transform_1, window_bounds = array<i64: 1, 128>}, {transform_indices = @transform_2, window_bounds = array<i64: 16, 128>}]} {
    %c0 = arith.constant 0 : index
    %c0_0 = arith.constant 0 : index
    %0 = vector.load %arg1[%c0, %c0_0] : memref<16x128xf32, #tpu.memory_space<vmem>>, vector<16x128xf32>
    %c0_1 = arith.constant 0 : index
    %c0_2 = arith.constant 0 : index
    %1 = vector.load %arg2[%c0_1, %c0_2] : memref<1x128xf32, #tpu.memory_space<vmem>>, vector<1x128xf32>
    %2 = vector.broadcast %1 : vector<1x128xf32> to vector<16x128xf32>
    %3 = arith.mulf %0, %2 : vector<16x128xf32>
    %c0_3 = arith.constant 0 : index
    %c0_4 = arith.constant 0 : index
    %4 = vector.load %arg3[%c0_3, %c0_4] : memref<16x128xf32, #tpu.memory_space<vmem>>, vector<16x128xf32>
    tpu.vector_store %arg3[%c0_3, %c0_4], %3 {strides = array<i32>} : memref<16x128xf32, #tpu.memory_space<vmem>>, vector<16x128xf32>,
    return
  }
  func.func @transform_0(%arg0: i32) -> (i32, i32) {
    %c0_i32 = arith.constant 0 : i32
    %c0_i32_0 = arith.constant 0 : i32
    return %arg0, %c0_i32 : i32, i32
  }
  func.func @transform_1(%arg0: i32) -> (i32, i32) {
    %c0_i32 = arith.constant 0 : i32
    %c0_i32_0 = arith.constant 0 : i32
    %c0_i32_1 = arith.constant 0 : i32
    return %c0_i32, %c0_i32_0 : i32, i32
  }
  func.func @transform_2(%arg0: i32) -> (i32, i32) {
    %c0_i32 = arith.constant 0 : i32
    %c0_i32_0 = arith.constant 0 : i32
    return %arg0, %c0_i32 : i32, i32
  }
}

</mosaic_0001>

<bundles_post_ra>
// kernel: tpu_custom_call.1
= control target key start
LH: loop header
LB: loop body
LE: loop exit
PB: predicated region body
PF: predicated region fallthrough
CT: control target
= control target key end

     0   :  { %7 = vsyncpa [#allocation3], 0  ;;  %s161_s0 = inlined_call_operand.hbm [shape: f32[16,128], index: 0, kind: input, shape index: {}]   ;;  %s162_s1 = inlined_call_operand.vmem [shape: f32[1,128], index: 1, kind: input, shape index: {}]   ;;  %s163_s2 = inlined_call_operand.hbm [shape: f32[16,128], index: 2, kind: output, shape index: {}]  }
   0x1   :  { %8 = vsyncpa [#allocation4], 0  ;;  %s109_s9 = smov [#allocation2]   ;;  %s61_s13 = scalar_lea.hbm %s161_s0, 256 }
   0x2   :  { %s14_s10 = sshll.u32 %s109_s9, 4  ;;  %p62_p0 = scmp.ne.s32.totalorder %s161_s0, %s61_s13  ;;  %s15_s10 = int_to_ptr.vmem [resolvable:$true] %s14_s10 }
   0x3   :  { %p65_p1 = scmp.lt.u32.totalorder %s61_s13, %s161_s0 }
   0x5   :  { %p67_p2 = pnand %p65_p1, %p62_p0 }
   0x7   :  { %70 = shalt.err (!%p67_p2)
}
   0x8   :  { %s71_s18 = scalar_lea.vmem %s15_s10, 256  ;;  %p76_p4 = scmp.lt.s32.totalorder %s15_s10, %s15_s10 }
   0x9   :  { %p72_p3 = scmp.ne.s32.totalorder %s15_s10, %s71_s18  ;;  %p77_p5 = scmp.lt.s32.totalorder %s71_s18, %s71_s18 }
   0xb   :  { %p78_p6 = por %p77_p5, %p76_p4 }
   0xd   :  { %p79_p7 = pnand %p78_p6, %p72_p3 }
   0xf   :  { %82 = shalt.err (!%p79_p7)
}
  0x10   :  { %s110_s19 = smov 128   ;;  %s111_s20 = smov 8  }
  0x11   :  { %20 = dma.hbm_to_vmem [thread:$0]  %s161_s0, 256, %s15_s10, [#allocation3], %s110_s19, %s110_s19, %s111_s20  }
  0x12   :  { %105 = dma.done.wait [#allocation3], 256  }
  0x13   :  { %106 = vsyncadd [#allocation3], 4294967040  ;;  %s112_s23 = smov [#allocation5]   ;;  %v26_v0 = vld [vmem:[#allocation2] sm:$0xff]  ;;  %v27_v2 = vld [vmem:[#allocation2 + $0x8] sm:$0xff] }
  0x14   :  { %s44_s24 = sshll.u32 %s112_s23, 4  ;;  %v56_v1 = vld [vmem:[%s162_s1] ss:$0 sm:$0xff]  ;;  %s45_s24 = int_to_ptr.vmem [resolvable:$true] %s44_s24 }
  0x15   :  { %v35_v3 = vmul.f32 %v56_v1, %v26_v0  ;;  %v36_v4 = vmul.f32 %v56_v1, %v27_v2  ;;  %s83_s27 = scalar_lea.vmem %s45_s24, 256  ;;  %p88_p9 = scmp.lt.s32.totalorder %s45_s24, %s45_s24 }
  0x16   :  { %p84_p8 = scmp.ne.s32.totalorder %s45_s24, %s83_s27  ;;  %p89_p10 = scmp.lt.s32.totalorder %s83_s27, %s83_s27 }
  0x17   :  { %37 = vst [vmem:[#allocation5] sm:$0xff] %v35_v3  ;;  %38 = vst [vmem:[#allocation5 + $0x8] sm:$0xff] %v36_v4 }
  0x18   :  { %p90_p11 = por %p89_p10, %p88_p9 }
  0x1a   :  { %p91_p12 = pnand %p90_p11, %p84_p8 }
  0x1c   :  { %94 = shalt.err (!%p91_p12)
}
  0x1d   :  { %s95_s29 = scalar_lea.hbm %s163_s2, 256 }
  0x1e   :  { %p96_p13 = scmp.ne.s32.totalorder %s163_s2, %s95_s29  ;;  %p99_p0 = scmp.lt.u32.totalorder %s95_s29, %s163_s2 }
  0x20   :  { %p101_p1 = pnand %p99_p0, %p96_p13 }
  0x22   :  { %104 = shalt.err (!%p101_p1)
}
  0x23   :  { %50 = dma.vmem_to_hbm [thread:$0]  %s45_s24, 256, %s163_s2, [#allocation4], %s110_s19, %s110_s19, %s111_s20  }
  0x24   :  { %107 = dma.done.wait [#allocation4], 256  }
  0x25   :  { %108 = vsyncadd [#allocation4], 4294967040 }
  0x26   :  { %54 = vsyncpa [#allocation3], 1 }
  0x27   :  { %55 = vsyncpa [#allocation4], 1 }

</bundles_post_ra>
